<compile_context>
chip_gen: v7x
topology: tpu7x:2x2x1
jax: 0.10.0
libtpu: 0.0.40
codegen_flags: <defaults>
</compile_context>

<pallas_src>
import jax
import jax.numpy as jnp
from jax.experimental import pallas as pl
from jax.experimental.pallas import tpu as pltpu

F = 128   # lane-padded feature width used on the MXU for every layer
RS = 128  # rows per in-kernel chunk (keeps intermediates in vregs)


def _round_up(a, m):
    return (a + m - 1) // m * m


def _choose_tb(batch, block_b):
    """Batch-tile size: <= block_b, a multiple of RS (or == batch when tiny),
    and >= 2 grid steps whenever possible so v7x megacore uses both cores."""
    if batch <= 16:
        return batch                      # single full-extent block
    half = pl.cdiv(batch, 2)
    if half <= RS:
        return _round_up(half, 16)        # one in-kernel chunk of this size
    return min(block_b, _round_up(half, RS))


def _make_kernel(cs, n_chunks, d_in, out_dim):
    """cs = rows per chunk, n_chunks = chunks per grid step (cs * n_chunks = TB)."""

    def kernel(x_ref, w_ref, b_ref, out_ref, xs_ref):
        # x_ref  : (TB, d_in)  f32/bf16  activation tile (ragged last block ok)
        # w_ref  : (3, 128, 128) bf16    packed zero-padded weights (x @ W layout)
        # b_ref  : (8, 128)    f32       rows 0..2 are b1/b2/b3 (zero-padded lanes)
        # out_ref: (TB, out_dim) f32     narrow output tile
        # xs_ref : (cs, 128)   bf16      lane-padding staging buffer (scratch)

        # Zero the staging buffer once per grid step so lanes d_in..127 stay 0
        # (each chunk only overwrites lanes 0..d_in-1).  Cheap: <=32 KiB VMEM.
        xs_ref[...] = jnp.zeros_like(xs_ref)

        def chunk(r):
            # Stage the activation chunk lane-padded to 128 in bf16.
            xs_ref[:, 0:d_in] = x_ref[pl.ds(r, cs), :].astype(jnp.bfloat16)
            x = xs_ref[...]                                   # (cs, 128) bf16

            b1 = b_ref[pl.ds(0, 1), :]                        # (1, 128), broadcasts
            b2 = b_ref[pl.ds(1, 1), :]
            b3 = b_ref[pl.ds(2, 1), :]

            # layer 1: Linear(100,100) + ReLU  (bf16 MXU, f32 accumulate)
            h = jnp.dot(x, w_ref[0], preferred_element_type=jnp.float32)
            h = jnp.maximum(h + b1, 0.0)
            # layer 2: Linear(100,10) + ReLU
            h = jnp.dot(h.astype(jnp.bfloat16), w_ref[1],
                        preferred_element_type=jnp.float32)
            h = jnp.maximum(h + b2, 0.0)
            # layer 3: Linear(10,out)
            h = jnp.dot(h.astype(jnp.bfloat16), w_ref[2],
                        preferred_element_type=jnp.float32)
            # Narrow store: only out_dim lanes go back to HBM.
            out_ref[pl.ds(r, cs), :] = (h + b3)[:, :out_dim].astype(out_ref.dtype)

        if n_chunks == 1:
            chunk(0)
        else:
            @pl.loop(0, n_chunks)
            def _(c):
                chunk(pl.multiple_of(c * cs, cs))

    return kernel


def mlp_syn3(x, w1, b1, w2, b2, w3, b3, *, block_b=2048):
    """Forward pass. Weights are (in_features, out_features) = PyTorch W^T."""
    B, d_in = x.shape
    out_dim = w3.shape[1]
    assert d_in <= F and out_dim <= F

    # --- batch tiling ------------------------------------------------------
    block_b = max(RS, (block_b // RS) * RS)     # keep block_b a multiple of RS
    TB = _choose_tb(B, block_b)
    if TB <= RS:
        cs, n_chunks = TB, 1
    else:
        cs, n_chunks = RS, TB // RS
    grid = (pl.cdiv(B, TB),)                    # ragged last block handled by Pallas

    # --- parameter packing (tiny, resident in VMEM across the whole grid) ---
    def pad_w(w):
        return jnp.zeros((F, F), jnp.float32).at[:w.shape[0], :w.shape[1]].set(w)

    w_slab = jnp.stack([pad_w(w1), pad_w(w2), pad_w(w3)]).astype(jnp.bfloat16)

    b_slab = jnp.zeros((8, F), jnp.float32)
    b_slab = b_slab.at[0, : b1.shape[0]].set(b1)
    b_slab = b_slab.at[1, : b2.shape[0]].set(b2)
    b_slab = b_slab.at[2, : b3.shape[0]].set(b3)

    flops = 2 * B * F * F * 3
    bytes_accessed = (x.size * x.dtype.itemsize + w_slab.size * 2
                      + b_slab.size * 4 + B * out_dim * 4)

    out = pl.pallas_call(
        _make_kernel(cs, n_chunks, d_in, out_dim),
        out_shape=jax.ShapeDtypeStruct((B, out_dim), jnp.float32),
        grid=grid,
        in_specs=[
            pl.BlockSpec((TB, d_in), lambda i: (i, 0)),     # x: tiled over batch
            pl.BlockSpec((3, F, F), lambda i: (0, 0, 0)),   # weights: resident
            pl.BlockSpec((8, F), lambda i: (0, 0)),         # biases : resident
        ],
        out_specs=pl.BlockSpec((TB, out_dim), lambda i: (i, 0)),
        scratch_shapes=[pltpu.VMEM((cs, F), jnp.bfloat16)],  # lane-pad staging
        compiler_params=pltpu.CompilerParams(
            dimension_semantics=("parallel",)),
        cost_estimate=pl.CostEstimate(flops=flops, transcendentals=0,
                                      bytes_accessed=bytes_accessed),
    )(x, w_slab, b_slab)
    return out


def init_params(key, out=2):
    """Deterministic parameter init (PyTorch-Linear-style uniform bounds)."""
    def linear(key, fan_in, fan_out):
        kw, kb = jax.random.split(key)
        bound = 1.0 / jnp.sqrt(fan_in)
        w = jax.random.uniform(kw, (fan_in, fan_out), jnp.float32,
                               minval=-bound, maxval=bound)
        b = jax.random.uniform(kb, (fan_out,), jnp.float32,
                               minval=-bound, maxval=bound)
        return w, b

    k1, k2, k3 = jax.random.split(key, 3)
    w1, b1 = linear(k1, 100, 100)
    w2, b2 = linear(k2, 100, 10)
    w3, b3 = linear(k3, 10, out)
    return w1, b1, w2, b2, w3, b3


if __name__ == "__main__":
    key = jax.random.PRNGKey(0)
    k_params, k_x1, k_x2 = jax.random.split(key, 3)

    w1, b1, w2, b2, w3, b3 = init_params(k_params, out=2)

    def ref_bf16(x):  # matches the kernel's precision path (bf16 MXU, f32 acc)
        bf = jnp.bfloat16
        h = jnp.dot(x.astype(bf), w1.astype(bf),
                    preferred_element_type=jnp.float32) + b1
        h = jnp.maximum(h, 0.0)
        h = jnp.dot(h.astype(bf), w2.astype(bf),
                    preferred_element_type=jnp.float32) + b2
        h = jnp.maximum(h, 0.0)
        return jnp.dot(h.astype(bf), w3.astype(bf),
                       preferred_element_type=jnp.float32) + b3

    def ref_f32(x):   # pure-f32 PyTorch-style reference (loose tolerance)
        h = jnp.maximum(x @ w1 + b1, 0.0)
        h = jnp.maximum(h @ w2 + b2, 0.0)
        return h @ w3 + b3

    # Small batch: single grid step, single in-kernel chunk.
    x_small = jax.random.normal(k_x1, (8, 100), jnp.float32)
    out_small = mlp_syn3(x_small, w1, b1, w2, b2, w3, b3)
    jax.block_until_ready(out_small)
    assert out_small.shape == (8, 2)
    assert jnp.allclose(out_small, ref_bf16(x_small), atol=2e-3, rtol=2e-3)
    assert jnp.allclose(out_small, ref_f32(x_small), atol=1e-1, rtol=1e-1)

    # Ragged batch: 2 grid steps (v7x megacore path), chunked inner loop,
    # masked writeback of the partial last block.
    x_big = jax.random.normal(k_x2, (300, 100), jnp.float32)
    out_big = mlp_syn3(x_big, w1, b1, w2, b2, w3, b3)
    jax.block_until_ready(out_big)
    assert out_big.shape == (300, 2)
    assert jnp.allclose(out_big, ref_bf16(x_big), atol=2e-3, rtol=2e-3)
    assert jnp.allclose(out_big, ref_f32(x_big), atol=1e-1, rtol=1e-1)

    print("KERNEL_OK")
</pallas_src>

<mosaic_0001>
module attributes {stable_mosaic.version = 11 : i64} {
  func.func @kernel(%arg0: i32, %arg1: memref<8x100xf32, #tpu.memory_space<vmem>>, %arg2: memref<3x128x128xbf16, #tpu.memory_space<vmem>>, %arg3: memref<8x128xf32, #tpu.memory_space<vmem>>, %arg4: memref<8x2xf32, #tpu.memory_space<vmem>>, %arg5: memref<8x128xbf16, #tpu.memory_space<vmem>>) attributes {dimension_semantics = [#tpu.dimension_semantics<parallel>], iteration_bounds = array<i64: 1>, scalar_prefetch = 0 : i64, scratch_operands = 1 : i64, tpu.core_type = #tpu.core_type<tc>, window_params = [{transform_indices = @transform_0, window_bounds = array<i64: 8, 100>}, {pipeline_mode = #tpu.pipeline_mode<synchronous>, transform_indices = @transform_1, window_bounds = array<i64: 3, 128, 128>}, {pipeline_mode = #tpu.pipeline_mode<synchronous>, transform_indices = @transform_2, window_bounds = array<i64: 8, 128>}, {transform_indices = @transform_3, window_bounds = array<i64: 8, 2>}]} {
    %cst = arith.constant 0.000000e+00 : bf16
    %0 = vector.broadcast %cst : bf16 to vector<8x128xbf16>
    %c0 = arith.constant 0 : index
    %c0_0 = arith.constant 0 : index
    %1 = vector.load %arg5[%c0, %c0_0] : memref<8x128xbf16, #tpu.memory_space<vmem>>, vector<8x128xbf16>
    tpu.vector_store %arg5[%c0, %c0_0], %0 {strides = array<i32>} : memref<8x128xbf16, #tpu.memory_space<vmem>>, vector<8x128xbf16>,
    %c0_1 = arith.constant 0 : index
    %c0_2 = arith.constant 0 : index
    %2 = vector.load %arg1[%c0_1, %c0_2] : memref<8x100xf32, #tpu.memory_space<vmem>>, vector<8x100xf32>
    %3 = arith.truncf %2 : vector<8x100xf32> to vector<8x100xbf16>
    %c0_3 = arith.constant 0 : index
    %c0_4 = arith.constant 0 : index
    %4 = vector.load %arg5[%c0_3, %c0_4] : memref<8x128xbf16, #tpu.memory_space<vmem>>, vector<8x100xbf16>
    tpu.vector_store %arg5[%c0_3, %c0_4], %3 {strides = array<i32>} : memref<8x128xbf16, #tpu.memory_space<vmem>>, vector<8x100xbf16>,
    %c0_5 = arith.constant 0 : index
    %c0_6 = arith.constant 0 : index
    %5 = vector.load %arg5[%c0_5, %c0_6] : memref<8x128xbf16, #tpu.memory_space<vmem>>, vector<8x128xbf16>
    %c0_7 = arith.constant 0 : index
    %c0_8 = arith.constant 0 : index
    %6 = vector.load %arg3[%c0_7, %c0_8] : memref<8x128xf32, #tpu.memory_space<vmem>>, vector<1x128xf32>
    %c1 = arith.constant 1 : index
    %c0_9 = arith.constant 0 : index
    %7 = vector.load %arg3[%c1, %c0_9] : memref<8x128xf32, #tpu.memory_space<vmem>>, vector<1x128xf32>
    %c2 = arith.constant 2 : index
    %c0_10 = arith.constant 0 : index
    %8 = vector.load %arg3[%c2, %c0_10] : memref<8x128xf32, #tpu.memory_space<vmem>>, vector<1x128xf32>
    %c0_11 = arith.constant 0 : index
    %c0_12 = arith.constant 0 : index
    %c0_13 = arith.constant 0 : index
    %9 = vector.load %arg2[%c0_11, %c0_12, %c0_13] : memref<3x128x128xbf16, #tpu.memory_space<vmem>>, vector<1x128x128xbf16>
    %10 = vector.shape_cast %9 : vector<1x128x128xbf16> to vector<128x128xbf16>
    %cst_14 = arith.constant dense<0.000000e+00> : vector<8x128xf32>
    %11 = tpu.matmul %5, %10, %cst_14 {dimension_numbers = #tpu.dot_dimension_numbers<[1], [0], [0], [1], [0, 0, 1, 1], [], []>} : vector<8x128xbf16>, vector<128x128xbf16>, vector<8x128xf32> -> vector<8x128xf32>
    %12 = vector.broadcast %6 : vector<1x128xf32> to vector<8x128xf32>
    %13 = arith.addf %11, %12 : vector<8x128xf32>
    %cst_15 = arith.constant 0.000000e+00 : f32
    %14 = vector.broadcast %cst_15 : f32 to vector<8x128xf32>
    %15 = arith.maximumf %13, %14 : vector<8x128xf32>
    %16 = arith.truncf %15 : vector<8x128xf32> to vector<8x128xbf16>
    %c1_16 = arith.constant 1 : index
    %c0_17 = arith.constant 0 : index
    %c0_18 = arith.constant 0 : index
    %17 = vector.load %arg2[%c1_16, %c0_17, %c0_18] : memref<3x128x128xbf16, #tpu.memory_space<vmem>>, vector<1x128x128xbf16>
    %18 = vector.shape_cast %17 : vector<1x128x128xbf16> to vector<128x128xbf16>
    %cst_19 = arith.constant dense<0.000000e+00> : vector<8x128xf32>
    %19 = tpu.matmul %16, %18, %cst_19 {dimension_numbers = #tpu.dot_dimension_numbers<[1], [0], [0], [1], [0, 0, 1, 1], [], []>} : vector<8x128xbf16>, vector<128x128xbf16>, vector<8x128xf32> -> vector<8x128xf32>
    %20 = vector.broadcast %7 : vector<1x128xf32> to vector<8x128xf32>
    %21 = arith.addf %19, %20 : vector<8x128xf32>
    %cst_20 = arith.constant 0.000000e+00 : f32
    %22 = vector.broadcast %cst_20 : f32 to vector<8x128xf32>
    %23 = arith.maximumf %21, %22 : vector<8x128xf32>
    %24 = arith.truncf %23 : vector<8x128xf32> to vector<8x128xbf16>
    %c2_21 = arith.constant 2 : index
    %c0_22 = arith.constant 0 : index
    %c0_23 = arith.constant 0 : index
    %25 = vector.load %arg2[%c2_21, %c0_22, %c0_23] : memref<3x128x128xbf16, #tpu.memory_space<vmem>>, vector<1x128x128xbf16>
    %26 = vector.shape_cast %25 : vector<1x128x128xbf16> to vector<128x128xbf16>
    %cst_24 = arith.constant dense<0.000000e+00> : vector<8x128xf32>
    %27 = tpu.matmul %24, %26, %cst_24 {dimension_numbers = #tpu.dot_dimension_numbers<[1], [0], [0], [1], [0, 0, 1, 1], [], []>} : vector<8x128xbf16>, vector<128x128xbf16>, vector<8x128xf32> -> vector<8x128xf32>
    %28 = vector.broadcast %8 : vector<1x128xf32> to vector<8x128xf32>
    %29 = arith.addf %27, %28 : vector<8x128xf32>
    %30 = vector.extract_strided_slice %29 {offsets = [0, 0], sizes = [8, 2], strides = [1, 1]} : vector<8x128xf32> to vector<8x2xf32>
    %c0_25 = arith.constant 0 : index
    %c0_26 = arith.constant 0 : index
    %31 = vector.load %arg4[%c0_25, %c0_26] : memref<8x2xf32, #tpu.memory_space<vmem>>, vector<8x2xf32>
    tpu.vector_store %arg4[%c0_25, %c0_26], %30 {strides = array<i32>} : memref<8x2xf32, #tpu.memory_space<vmem>>, vector<8x2xf32>,
    return
  }
  func.func @transform_0(%arg0: i32) -> (i32, i32) {
    %c0_i32 = arith.constant 0 : i32
    %c0_i32_0 = arith.constant 0 : i32
    return %arg0, %c0_i32 : i32, i32
  }
  func.func @transform_1(%arg0: i32) -> (i32, i32, i32) {
    %c0_i32 = arith.constant 0 : i32
    %c0_i32_0 = arith.constant 0 : i32
    %c0_i32_1 = arith.constant 0 : i32
    %c0_i32_2 = arith.constant 0 : i32
    return %c0_i32, %c0_i32_0, %c0_i32_1 : i32, i32, i32
  }
  func.func @transform_2(%arg0: i32) -> (i32, i32) {
    %c0_i32 = arith.constant 0 : i32
    %c0_i32_0 = arith.constant 0 : i32
    %c0_i32_1 = arith.constant 0 : i32
    return %c0_i32, %c0_i32_0 : i32, i32
  }
  func.func @transform_3(%arg0: i32) -> (i32, i32) {
    %c0_i32 = arith.constant 0 : i32
    %c0_i32_0 = arith.constant 0 : i32
    return %arg0, %c0_i32 : i32, i32
  }
}

</mosaic_0001>

<bundles_post_ra>
// kernel: tpu_custom_call.1
= control target key start
LH: loop header
LB: loop body
LE: loop exit
PB: predicated region body
PF: predicated region fallthrough
CT: control target
= control target key end

     0   :  { %8 = vsyncpa [#allocation4], 0  ;;  %s712_s0 = inlined_call_operand.hbm [shape: f32[8,100], index: 0, kind: input, shape index: {}]   ;;  %s713_s1 = inlined_call_operand.hbm [shape: bf16[3,128,128], index: 1, kind: input, shape index: {}]   ;;  %s714_s2 = inlined_call_operand.hbm [shape: f32[8,128], index: 2, kind: input, shape index: {}]   ;;  %s715_s3 = inlined_call_operand.vmem [shape: f32[8,2], index: 3, kind: output, shape index: {}]  }
   0x1   :  { %9 = vsyncpa [#allocation6], 0  ;;  %s615_s12 = smov [#allocation5]   ;;  %s545_s16 = scalar_lea.hbm %s713_s1, 3072 }
   0x2   :  { %s25_s13 = sshll.u32 %s615_s12, 4  ;;  %p546_p0 = scmp.ne.s32.totalorder %s713_s1, %s545_s16  ;;  %s26_s13 = int_to_ptr.vmem [resolvable:$true] %s25_s13 }
   0x3   :  { %p549_p1 = scmp.lt.u32.totalorder %s545_s16, %s713_s1 }
   0x5   :  { %p551_p2 = pnand %p549_p1, %p546_p0 }
   0x7   :  { %554 = shalt.err (!%p551_p2)
}
   0x8   :  { %s555_s21 = scalar_lea.vmem %s26_s13, 3072  ;;  %p560_p4 = scmp.lt.s32.totalorder %s26_s13, %s26_s13 }
   0x9   :  { %p556_p3 = scmp.ne.s32.totalorder %s26_s13, %s555_s21  ;;  %p561_p5 = scmp.lt.s32.totalorder %s555_s21, %s555_s21 }
   0xb   :  { %p562_p6 = por %p561_p5, %p560_p4 }
   0xd   :  { %p563_p7 = pnand %p562_p6, %p556_p3 }
   0xf   :  { %566 = shalt.err (!%p563_p7)
}
  0x10   :  { %s616_s22 = smov 64   ;;  %s617_s23 = smov 4  }
  0x11   :  { %31 = dma.hbm_to_vmem [thread:$0]  %s713_s1, 3072, %s26_s13, [#allocation6], %s616_s22, %s616_s22, %s617_s23  }
  0x12   :  { %s618_s26 = smov [#allocation3]   ;;  %s619_s28 = smov [#allocation7]  }
  0x13   :  { %s16_s27 = sshll.u32 %s618_s26, 4  ;;  %s38_s29 = sshll.u32 %s619_s28, 4  ;;  %s17_s27 = int_to_ptr.vmem [resolvable:$true] %s16_s27  ;;  %s39_s29 = int_to_ptr.vmem [resolvable:$true] %s38_s29 }
  0x14   :  { %s567_s5 = scalar_lea.hbm %s712_s0, 128 }
  0x15   :  { %p568_p8 = scmp.ne.s32.totalorder %s712_s0, %s567_s5  ;;  %p571_p9 = scmp.lt.u32.totalorder %s567_s5, %s712_s0 }
  0x17   :  { %p573_p10 = pnand %p571_p9, %p568_p8 }
  0x19   :  { %576 = shalt.err (!%p573_p10)
}
  0x1a   :  { %s577_s1 = scalar_lea.vmem %s17_s27, 128  ;;  %p582_p12 = scmp.lt.s32.totalorder %s17_s27, %s17_s27 }
  0x1b   :  { %p578_p11 = scmp.ne.s32.totalorder %s17_s27, %s577_s1  ;;  %p583_p13 = scmp.lt.s32.totalorder %s577_s1, %s577_s1 }
  0x1d   :  { %p584_p0 = por %p583_p13, %p582_p12 }
  0x1f   :  { %p585_p1 = pnand %p584_p0, %p578_p11 }
  0x21   :  { %588 = shalt.err (!%p585_p1)
}
  0x22   :  { %19 = dma.hbm_to_vmem [thread:$0]  %s712_s0, 128, %s17_s27, [#allocation4]  }
  0x23   :  { %s589_s14 = scalar_lea.hbm %s714_s2, 128 }
  0x24   :  { %p590_p2 = scmp.ne.s32.totalorder %s714_s2, %s589_s14  ;;  %p593_p3 = scmp.lt.u32.totalorder %s589_s14, %s714_s2 }
  0x26   :  { %p595_p4 = pnand %p593_p3, %p590_p2 }
  0x28   :  { %598 = shalt.err (!%p595_p4)
}
  0x29   :  { %s599_s19 = scalar_lea.vmem %s39_s29, 128  ;;  %p604_p6 = scmp.lt.s32.totalorder %s39_s29, %s39_s29 }
  0x2a   :  { %p600_p5 = scmp.ne.s32.totalorder %s39_s29, %s599_s19  ;;  %p605_p7 = scmp.lt.s32.totalorder %s599_s19, %s599_s19 }
  0x2c   :  { %p606_p8 = por %p605_p7, %p604_p6 }
  0x2e   :  { %p607_p9 = pnand %p606_p8, %p600_p5 }
  0x30   :  { %610 = shalt.err (!%p607_p9)
}
  0x31   :  { %41 = dma.hbm_to_vmem [thread:$0]  %s714_s2, 128, %s39_s29, [#allocation6]  }
  0x32   :  { %611 = dma.done.wait [#allocation4], 128  }
  0x33   :  { %612 = vsyncadd [#allocation4], 4294967168 }
  0x34   :  { %613 = dma.done.wait [#allocation6], 3200  }
  0x35   :  { %614 = vsyncadd [#allocation6], 4294964096  ;;  %v620_v0 = vmov 0.0   ;;  %vm621_vm0 = vmmov 0   ;;  %v622_v1 = vmov 0   ;;  %v521_v2 = vld [vmem:[#allocation5] sm:$0xff]  }
  0x36   :  { %453 = vmatprep.subr.bf16.mxu0 %v620_v0  ;;  %469 = vmatprep.mubr.msk.bf16.mxu0 %vm621_vm0, %v620_v0  ;;  %52 = vst [vmem:[#allocation2] sm:$0xf] %v622_v1  ;;  %v522_v3 = vld [vmem:[#allocation5 + $0x8] sm:$0xff]   ;;  %v523_v4 = vld [vmem:[#allocation5 + $0x10] sm:$0xff]   ;;  %v53_v5 = vld [vmem:[#allocation3] sm:$0xff]  ;;  %vm55_vm1 = vcmask 814080  }
  0x37   :  { %473 = vmatprep.subr.bf16.mxu1 %v620_v0  ;;  %489 = vmatprep.mubr.msk.bf16.mxu1 %vm621_vm0, %v620_v0  ;;  %v54_v6 = vpack.c.bf16 %v53_v5, %v53_v5  ;;  %v529_v7 = vld [vmem:[#allocation5 + $0x40] sm:$0xff]   ;;  %v524_v8 = vld [vmem:[#allocation5 + $0x18] sm:$0xff]   ;;  %v530_v9 = vld [vmem:[#allocation5 + $0x48] sm:$0xff]   ;;  %vm391_vm2 = vcmask 15360  }
  0x38   :  { %454 = vmatpush3.bf16.msra.mxu0 %v521_v2  ;;  %474 = vmatpush3.bf16.msra.mxu1 %v529_v7  ;;  %v525_v10 = vld [vmem:[#allocation5 + $0x20] sm:$0xff]   ;;  %v531_v11 = vld [vmem:[#allocation5 + $0x50] sm:$0xff]   ;;  %v526_v12 = vld [vmem:[#allocation5 + $0x28] sm:$0xff]  }
  0x39   :  { %455 = vmatprep.subr.bf16.mxu0 %v620_v0  ;;  %56 = vst.msk [vmem:[#allocation2] sm:$0xf] %vm55_vm1, %v54_v6  ;;  %475 = vmatprep.subr.bf16.mxu1 %v620_v0  ;;  %v532_v13 = vld [vmem:[#allocation5 + $0x58] sm:$0xff]   ;;  %v527_v14 = vld [vmem:[#allocation5 + $0x30] sm:$0xff]   ;;  %v533_v15 = vld [vmem:[#allocation5 + $0x60] sm:$0xff]  }
  0x3a   :  { %v528_v16 = vld [vmem:[#allocation5 + $0x38] sm:$0xff]   ;;  %v534_v17 = vld [vmem:[#allocation5 + $0x68] sm:$0xff]   ;;  %v535_v19 = vld [vmem:[#allocation5 + $0x70] sm:$0xff]  }
  0x3b   :  { %v536_v20 = vld [vmem:[#allocation5 + $0x78] sm:$0xff]   ;;  %v537_v21 = vld [vmem:[#allocation5 + $0x80] sm:$0xff]   ;;  %v538_v22 = vld [vmem:[#allocation5 + $0x88] sm:$0xff]  }
  0x3c   :  { %456 = vmatpush3.bf16.msra.mxu0 %v522_v3  ;;  %476 = vmatpush3.bf16.msra.mxu1 %v530_v9  ;;  %v539_v23 = vld [vmem:[#allocation5 + $0x90] sm:$0xff]   ;;  %v540_v24 = vld [vmem:[#allocation5 + $0x98] sm:$0xff]   ;;  %v541_v25 = vld [vmem:[#allocation5 + $0xa0] sm:$0xff]  }
  0x3d   :  { %457 = vmatprep.subr.bf16.mxu0 %v620_v0  ;;  %477 = vmatprep.subr.bf16.mxu1 %v620_v0  ;;  %v542_v26 = vld [vmem:[#allocation5 + $0xa8] sm:$0xff]   ;;  %v399_v27 = vld [vmem:[#allocation7] ss:$0 sm:$0xff]  ;;  %v543_v35 = vld [vmem:[#allocation5 + $0xb0] sm:$0xff]  }
  0x3e   :  { %v544_v36 = vld [vmem:[#allocation5 + $0xb8] sm:$0xff]   ;;  %v408_v37 = vld [vmem:[#allocation7 + $0x1] ss:$0 sm:$0xff]  ;;  %v417_v45 = vld [vmem:[#allocation7 + $0x2] ss:$0 sm:$0xff] }
  0x40   :  { %458 = vmatpush3.bf16.msra.mxu0 %v523_v4  ;;  %478 = vmatpush3.bf16.msra.mxu1 %v531_v11  ;;  %v57_v18 = vld [vmem:[#allocation2] sm:$0xf] }
  0x41   :  { %459 = vmatprep.subr.bf16.mxu0 %v620_v0  ;;  %479 = vmatprep.subr.bf16.mxu1 %v620_v0 }
  0x44   :  { %460 = vmatpush3.bf16.msra.mxu0 %v524_v8  ;;  %480 = vmatpush3.bf16.msra.mxu1 %v532_v13 }
  0x45   :  { %461 = vmatprep.subr.bf16.mxu0 %v620_v0  ;;  %481 = vmatprep.subr.bf16.mxu1 %v620_v0 }
  0x48   :  { %462 = vmatpush3.bf16.msra.mxu0 %v525_v10  ;;  %482 = vmatpush3.bf16.msra.mxu1 %v533_v15 }
  0x49   :  { %463 = vmatprep.subr.bf16.mxu0 %v620_v0  ;;  %483 = vmatprep.subr.bf16.mxu1 %v620_v0 }
  0x4c   :  { %464 = vmatpush3.bf16.msra.mxu0 %v526_v12  ;;  %484 = vmatpush3.bf16.msra.mxu1 %v534_v17 }
  0x4d   :  { %465 = vmatprep.subr.bf16.mxu0 %v620_v0  ;;  %485 = vmatprep.subr.bf16.mxu1 %v620_v0 }
  0x50   :  { %466 = vmatpush3.bf16.msra.mxu0 %v527_v14  ;;  %486 = vmatpush3.bf16.msra.mxu1 %v535_v19 }
  0x51   :  { %467 = vmatprep.subr.bf16.mxu0 %v620_v0  ;;  %487 = vmatprep.subr.bf16.mxu1 %v620_v0 }
  0x54   :  { %468 = vmatpush3.bf16.msra.mxu0 %v528_v16  ;;  %488 = vmatpush3.bf16.msra.mxu1 %v536_v20 }
  0x55   :  { %493 = vmatprep.subr.bf16.mxu0 %v620_v0 }
  0x57   :  { %470 = vmatmul.mubr.bf16.vlgmr.msra.gmra.mrb[0].mxu0 %v57_v18 }
  0x58   :  { %509 = vmatprep.mubr.msk.bf16.mxu0 %vm621_vm0, %v620_v0  ;;  %494 = vmatpush3.bf16.msra.mxu0 %v537_v21 }
  0x59   :  { %495 = vmatprep.subr.bf16.mxu0 %v620_v0 }
  0x5c   :  { %496 = vmatpush3.bf16.msra.mxu0 %v538_v22 }
  0x5d   :  { %497 = vmatprep.subr.bf16.mxu0 %v620_v0 }
  0x60   :  { %498 = vmatpush3.bf16.msra.mxu0 %v539_v23 }
  0x61   :  { %499 = vmatprep.subr.bf16.mxu0 %v620_v0 }
  0x64   :  { %500 = vmatpush3.bf16.msra.mxu0 %v540_v24 }
  0x65   :  { %501 = vmatprep.subr.bf16.mxu0 %v620_v0 }
  0x68   :  { %502 = vmatpush3.bf16.msra.mxu0 %v541_v25 }
  0x69   :  { %503 = vmatprep.subr.bf16.mxu0 %v620_v0 }
  0x6c   :  { %504 = vmatpush3.bf16.msra.mxu0 %v542_v26 }
  0x6d   :  { %505 = vmatprep.subr.bf16.mxu0 %v620_v0 }
  0x70   :  { %506 = vmatpush3.bf16.msra.mxu0 %v543_v35 }
  0x71   :  { %507 = vmatprep.subr.bf16.mxu0 %v620_v0 }
  0x74   :  { %508 = vmatpush3.bf16.msra.mxu0 %v544_v36 }
 0x12a   :  { %v163_v28 = vpop.f32.mrb[0].mxu0 }
 0x12b   :  { %v164_v29 = vadd.f32 %v399_v27, %v163_v28  ;;  %v471_v30 = vpop.f32.mrb[1].mxu0 }
 0x12c   :  { %v166_v31 = vpop.f32.mrb[2].mxu0 }
 0x12d   :  { %v169_v32 = vmax.f32 %v164_v29, 0.0  ;;  %v472_v33 = vpop.f32.mrb[3].mxu0 }
 0x12f   :  { %v170_v34 = vpack.c.bf16 %v169_v32, %v169_v32 }
 0x131   :  { %490 = vmatmul.mubr.bf16.vlgmr.msra.gmra.mrb[0].mxu1 %v170_v34 }
 0x204   :  { %v274_v38 = vpop.f32.mrb[0].mxu1 }
 0x205   :  { %v275_v39 = vadd.f32 %v408_v37, %v274_v38  ;;  %v491_v40 = vpop.f32.mrb[1].mxu1 }
 0x206   :  { %v277_v41 = vpop.f32.mrb[2].mxu1 }
 0x207   :  { %v280_v42 = vmax.f32 %v275_v39, 0.0  ;;  %v492_v43 = vpop.f32.mrb[3].mxu1 }
 0x209   :  { %v281_v44 = vpack.c.bf16 %v280_v42, %v280_v42 }
 0x20b   :  { %510 = vmatmul.mubr.bf16.vlgmr.msra.gmra.mrb[4].mxu0 %v281_v44 }
 0x2de   :  { %v385_v46 = vpop.f32.mrb[4].mxu0 }
 0x2df   :  { %v386_v47 = vadd.f32 %v417_v45, %v385_v46  ;;  %v511_v48 = vpop.f32.mrb[5].mxu0 }
 0x2e0   :  { %v388_v49 = vpop.f32.mrb[6].mxu0 }
 0x2e1   :  { %392 = vst.msk [vmem:[%s715_s3] sm:$0xff] %vm391_vm2, %v386_v47  ;;  %v512_v50 = vpop.f32.mrb[7].mxu0 }
 0x2e2   :  { %397 = vsyncpa [#allocation4], 1 }
 0x2e3   :  { %398 = vsyncpa [#allocation6], 1 }

</bundles_post_ra>
